<compile_context>
chip_gen: v5e
topology: v5e:2x2
jax: 0.10.0
libtpu: 0.0.40
codegen_flags: <defaults>
</compile_context>

<pallas_src>
import jax
import jax.numpy as jnp
from jax.experimental import pallas as pl
from jax.experimental.pallas import tpu as pltpu


# ----------------------------------------------------------------------------
# Fused MLP kernel: relu(W1 @ x^T + b1) -> W2 @ h + b2, all on one batch tile
# ----------------------------------------------------------------------------
def _mlp_fused_kernel(xt_ref, w1_ref, b1_ref, w2_ref, b2_ref, o_ref):
    # fc1 + ReLU:  (15, 10) @ (10, TB) -> (15, TB)
    h = jnp.dot(w1_ref[...], xt_ref[...], preferred_element_type=jnp.float32)
    h = jnp.maximum(h + b1_ref[...], 0.0)
    # fc2:         (1, 15) @ (15, TB) -> (1, TB)   (lane-dense store)
    o_ref[...] = (
        jnp.dot(w2_ref[...], h, preferred_element_type=jnp.float32)
        + b2_ref[...]
    )


def d_forward(x, params, *, tb=128):
    """x: (B, 10) float32 -> (B, 1) float32, matching D.forward semantics."""
    B, f_in = x.shape
    w1, b1, w2, b2 = params["w1"], params["b1"], params["w2"], params["b2"]
    hidden = w1.shape[0]
    f_out = w2.shape[0]

    # Batch lives on the lane axis; pad it to a multiple of the lane tile.
    b_pad = ((B + tb - 1) // tb) * tb
    x_t = jnp.transpose(x)                                 # (10, B)
    if b_pad != B:
        x_t = jnp.pad(x_t, ((0, 0), (0, b_pad - B)))       # (10, B_pad)

    out_t = pl.pallas_call(
        _mlp_fused_kernel,
        out_shape=jax.ShapeDtypeStruct((f_out, b_pad), jnp.float32),
        grid=(b_pad // tb,),
        in_specs=[
            pl.BlockSpec((f_in, tb), lambda i: (0, i)),       # x^T batch tile
            pl.BlockSpec((hidden, f_in), lambda i: (0, 0)),   # W1 (15, 10)
            pl.BlockSpec((hidden, 1), lambda i: (0, 0)),      # b1 (15, 1)
            pl.BlockSpec((f_out, hidden), lambda i: (0, 0)),  # W2 (1, 15)
            pl.BlockSpec((f_out, 1), lambda i: (0, 0)),       # b2 (1, 1)
        ],
        out_specs=pl.BlockSpec((f_out, tb), lambda i: (0, i)),
        compiler_params=pltpu.CompilerParams(
            dimension_semantics=("parallel",)),
    )(x_t, w1, b1, w2, b2)

    # Drop the batch padding and restore (B, 1).
    return out_t[:, :B].reshape(B, f_out)


# ----------------------------------------------------------------------------
# Parameters (deterministic synthetic init, PyTorch Linear layout (out, in))
# ----------------------------------------------------------------------------
def init_params(key):
    k1, k2, k3, k4 = jax.random.split(key, 4)
    bound1 = 1.0 / jnp.sqrt(10.0)
    bound2 = 1.0 / jnp.sqrt(15.0)
    return {
        "w1": jax.random.uniform(k1, (15, 10), jnp.float32, -bound1, bound1),
        "b1": jax.random.uniform(k2, (15, 1), jnp.float32, -bound1, bound1),
        "w2": jax.random.uniform(k3, (1, 15), jnp.float32, -bound2, bound2),
        "b2": jax.random.uniform(k4, (1, 1), jnp.float32, -bound2, bound2),
    }


if __name__ == "__main__":
    key = jax.random.PRNGKey(0)
    pkey, xkey = jax.random.split(key)
    params = init_params(pkey)

    # D.forward expects (batch, 10)
    x = jax.random.normal(xkey, (2, 10), jnp.float32)

    out = jax.jit(d_forward)(x, params)
    out = jax.block_until_ready(out)

    # Pure-JAX reference of the same forward pass.
    ref = jnp.maximum(x @ params["w1"].T + params["b1"][:, 0], 0.0)
    ref = ref @ params["w2"].T + params["b2"][:, 0]

    assert out.shape == (2, 1), out.shape
    assert bool(jnp.all(jnp.isfinite(out)))
    assert bool(jnp.allclose(out, ref, atol=1e-3, rtol=1e-3))
    print("KERNEL_OK")
</pallas_src>

<mosaic_0001>
module attributes {stable_mosaic.version = 11 : i64} {
  func.func @_mlp_fused_kernel(%arg0: i32, %arg1: memref<10x128xf32, #tpu.memory_space<vmem>>, %arg2: memref<15x10xf32, #tpu.memory_space<vmem>>, %arg3: memref<15x1xf32, #tpu.memory_space<vmem>>, %arg4: memref<1x15xf32, #tpu.memory_space<vmem>>, %arg5: memref<1x1xf32, #tpu.memory_space<vmem>>, %arg6: memref<1x128xf32, #tpu.memory_space<vmem>>) attributes {dimension_semantics = [#tpu.dimension_semantics<parallel>], iteration_bounds = array<i64: 1>, scalar_prefetch = 0 : i64, scratch_operands = 0 : i64, tpu.core_type = #tpu.core_type<tc>, window_params = [{transform_indices = @transform_0, window_bounds = array<i64: 10, 128>}, {pipeline_mode = #tpu.pipeline_mode<synchronous>, transform_indices = @transform_1, window_bounds = array<i64: 15, 10>}, {pipeline_mode = #tpu.pipeline_mode<synchronous>, transform_indices = @transform_2, window_bounds = array<i64: 15, 1>}, {pipeline_mode = #tpu.pipeline_mode<synchronous>, transform_indices = @transform_3, window_bounds = array<i64: 1, 15>}, {pipeline_mode = #tpu.pipeline_mode<synchronous>, transform_indices = @transform_4, window_bounds = array<i64: 1, 1>}, {transform_indices = @transform_5, window_bounds = array<i64: 1, 128>}]} {
    %c0 = arith.constant 0 : index
    %c0_0 = arith.constant 0 : index
    %0 = vector.load %arg2[%c0, %c0_0] : memref<15x10xf32, #tpu.memory_space<vmem>>, vector<15x10xf32>
    %c0_1 = arith.constant 0 : index
    %c0_2 = arith.constant 0 : index
    %1 = vector.load %arg1[%c0_1, %c0_2] : memref<10x128xf32, #tpu.memory_space<vmem>>, vector<10x128xf32>
    %cst = arith.constant dense<0.000000e+00> : vector<15x128xf32>
    %2 = tpu.matmul %0, %1, %cst {dimension_numbers = #tpu.dot_dimension_numbers<[1], [0], [0], [1], [0, 0, 1, 1], [], []>} : vector<15x10xf32>, vector<10x128xf32>, vector<15x128xf32> -> vector<15x128xf32>
    %c0_3 = arith.constant 0 : index
    %c0_4 = arith.constant 0 : index
    %3 = vector.load %arg3[%c0_3, %c0_4] : memref<15x1xf32, #tpu.memory_space<vmem>>, vector<15x1xf32>
    %4 = vector.broadcast %3 : vector<15x1xf32> to vector<15x128xf32>
    %5 = arith.addf %2, %4 : vector<15x128xf32>
    %cst_5 = arith.constant 0.000000e+00 : f32
    %6 = vector.broadcast %cst_5 : f32 to vector<15x128xf32>
    %7 = arith.maximumf %5, %6 : vector<15x128xf32>
    %c0_6 = arith.constant 0 : index
    %c0_7 = arith.constant 0 : index
    %8 = vector.load %arg4[%c0_6, %c0_7] : memref<1x15xf32, #tpu.memory_space<vmem>>, vector<1x15xf32>
    %cst_8 = arith.constant dense<0.000000e+00> : vector<1x128xf32>
    %9 = tpu.matmul %8, %7, %cst_8 {dimension_numbers = #tpu.dot_dimension_numbers<[1], [0], [0], [1], [0, 0, 1, 1], [], []>} : vector<1x15xf32>, vector<15x128xf32>, vector<1x128xf32> -> vector<1x128xf32>
    %c0_9 = arith.constant 0 : index
    %c0_10 = arith.constant 0 : index
    %10 = vector.load %arg5[%c0_9, %c0_10] : memref<1x1xf32, #tpu.memory_space<vmem>>, vector<1x1xf32>
    %11 = vector.broadcast %10 : vector<1x1xf32> to vector<1x128xf32>
    %12 = arith.addf %9, %11 : vector<1x128xf32>
    %c0_11 = arith.constant 0 : index
    %c0_12 = arith.constant 0 : index
    %13 = vector.load %arg6[%c0_11, %c0_12] : memref<1x128xf32, #tpu.memory_space<vmem>>, vector<1x128xf32>
    tpu.vector_store %arg6[%c0_11, %c0_12], %12 {strides = array<i32>} : memref<1x128xf32, #tpu.memory_space<vmem>>, vector<1x128xf32>,
    return
  }
  func.func @transform_0(%arg0: i32) -> (i32, i32) {
    %c0_i32 = arith.constant 0 : i32
    %c0_i32_0 = arith.constant 0 : i32
    return %c0_i32, %arg0 : i32, i32
  }
  func.func @transform_1(%arg0: i32) -> (i32, i32) {
    %c0_i32 = arith.constant 0 : i32
    %c0_i32_0 = arith.constant 0 : i32
    %c0_i32_1 = arith.constant 0 : i32
    return %c0_i32, %c0_i32_0 : i32, i32
  }
  func.func @transform_2(%arg0: i32) -> (i32, i32) {
    %c0_i32 = arith.constant 0 : i32
    %c0_i32_0 = arith.constant 0 : i32
    %c0_i32_1 = arith.constant 0 : i32
    return %c0_i32, %c0_i32_0 : i32, i32
  }
  func.func @transform_3(%arg0: i32) -> (i32, i32) {
    %c0_i32 = arith.constant 0 : i32
    %c0_i32_0 = arith.constant 0 : i32
    %c0_i32_1 = arith.constant 0 : i32
    return %c0_i32, %c0_i32_0 : i32, i32
  }
  func.func @transform_4(%arg0: i32) -> (i32, i32) {
    %c0_i32 = arith.constant 0 : i32
    %c0_i32_0 = arith.constant 0 : i32
    %c0_i32_1 = arith.constant 0 : i32
    return %c0_i32, %c0_i32_0 : i32, i32
  }
  func.func @transform_5(%arg0: i32) -> (i32, i32) {
    %c0_i32 = arith.constant 0 : i32
    %c0_i32_0 = arith.constant 0 : i32
    return %c0_i32, %arg0 : i32, i32
  }
}

</mosaic_0001>

<bundles_post_ra>
// kernel: d_forward.1
= control target key start
LH: loop header
LB: loop body
LE: loop exit
PB: predicated region body
PF: predicated region fallthrough
CT: control target
= control target key end

     0   :  { %vm45_vm0 = vcmask 1041408   ;;  %v125_v2 = vmov 0   ;;  %vm38_vm1 = vcmask 80896   ;;  %vm86_vm2 = vcmask 1046528   ;;  %s183_s0 = inlined_call_operand.vmem [shape: f32[10,128], index: 0, kind: input, shape index: {}]   ;;  %s184_s1 = inlined_call_operand.vmem [shape: f32[15,10], index: 1, kind: input, shape index: {}]   ;;  %s185_s2 = inlined_call_operand.vmem [shape: f32[15,1], index: 2, kind: input, shape index: {}]   ;;  %s186_s4 = inlined_call_operand.<no memory space> [shape: f32[1,1], index: 4, kind: input, shape index: {}]   ;;  %s187_s3 = inlined_call_operand.vmem [shape: f32[1,15], index: 3, kind: input, shape index: {}]   ;;  %s188_s5 = inlined_call_operand.vmem [shape: f32[1,128], index: 5, kind: output, shape index: {}]  }
   0x1   :  { %v25_v0 = vld [vmem:[%s183_s0 + $0x8] sm:$0x3]  ;;  %v24_v1 = vld [vmem:[%s183_s0] sm:$0xff]  ;;  %123 = vset.pattern.permute.xlu0 %v125_v2  ;;  %124 = vset.pattern.permute.xlu1 %v125_v2  ;;  %v10_v7 = vstv %s186_s4  ;;  %vm82_vm3 = vcmask 121856  }
   0x2   :  { %115 = vmatpush.msk.msra.mxu0 %vm45_vm0, %v25_v0  ;;  %120 = vmatpush.msk.msra.mxu2 %vm45_vm0, %v25_v0  ;;  %v22_v3 = vld [vmem:[%s184_s1] sm:$0xff]  ;;  %v23_v4 = vld [vmem:[%s184_s1 + $0x8] sm:$0x7f]  ;;  %11 = vst [vmem:[#allocation2] sm:$0x1] %v10_v7 }
   0x3   :  { %v27_v5 = vld [vmem:[%s185_s2 + $0x8] sm:$0x7f]  ;;  %v26_v6 = vld [vmem:[%s185_s2] sm:$0xff] }
   0x4   :  { %35 = vperm.xlu0 %123, %v27_v5   ;;  %64 = vmatpush.msra.mxu0 %v24_v1  ;;  %v74_v17 = vld [vmem:[%s187_s3] sm:$0x1] }
   0x5   :  { %121 = vmatpush.msra.mxu2 %v24_v1  ;;  %116 = vmatmul.msk.f32.vlgmr.msra.gmra.mxu0 %vm38_vm1, %v22_v3 }
   0x6   :  { %117 = vmatmul.msk.f32.vlgmr.msra.gmra.mxu2 %vm38_vm1, %v23_v4 }
   0x9   :  { %v75_v8 = vld [vmem:[#allocation2] sm:$0x1] }
   0xa   :  { %78 = vperm.xlu1 %124, %v75_v8  }
   0xc   :  { %30 = vperm.xlu0 %123, %v26_v6  }
  0x76   :  { %v36_v9 = vpop.permute.xlu0 %35 }
  0x7c   :  { %v79_v18 = vpop.permute.xlu1 %78 }
  0x7d   :  { %v81_v19 = vperm.slane %v79_v18, 0 }
  0x7e   :  { %v31_v10 = vpop.permute.xlu0 %30 }
  0x82   :  { %v66_v11 = vpop.f32.mrf.mxu0 }
  0x83   :  { %v67_v13 = vadd.f32 %v66_v11, %v31_v10 }
  0x85   :  { %v72_v16 = vmax.f32 %v67_v13, 0.0 }
  0x89   :  { %v69_v12 = vpop.f32.mrf.mxu2 }
  0x8a   :  { %v70_v14 = vadd.f32 %v69_v12, %v36_v9 }
  0x8c   :  { %v73_v15 = vmax.f32 %v70_v14, 0.0 }
  0x8e   :  { %118 = vmatpush.msk.msra.mxu1 %vm86_vm2, %v73_v15 }
  0x90   :  { %105 = vmatpush.msra.mxu1 %v72_v16 }
  0x91   :  { %119 = vmatmul.msk.f32.vlgmr.msra.gmra.mxu1 %vm82_vm3, %v74_v17 }
 0x10e   :  { %v107_v20 = vpop.f32.mrf.mxu1 }
 0x10f   :  { %v108_v21 = vadd.f32 %v107_v20, %v81_v19 }
 0x111   :  { %110 = vst [vmem:[%s188_s5] sm:$0x1] %v108_v21 }

</bundles_post_ra>
